<compile_context>
chip_gen: v6e
topology: v6e:2x2x1
jax: 0.10.0
libtpu: 0.0.40
codegen_flags: <defaults>
</compile_context>

<pallas_src>
import jax
import jax.numpy as jnp
from jax.experimental import pallas as pl
from jax.experimental.pallas import tpu as pltpu


def _self_attn_post_kernel(wc_ref, bc_ref, bi_ref, xf_ref, xq_ref, att_ref, o_ref):
    # wc_ref: (C, C) f32          bc_ref / bi_ref: (C, 1) f32
    # xf_ref: (1, C, HW) f32      all key tokens (channel-major)
    # xq_ref: (1, C, TQ) f32      query-token slice (for the residual)
    # att_ref:(1, TQ, HW) bf16    o_ref: (1, C, TQ)
    x_full = xf_ref[0]                                            # (C, HW)

    # Folded (gamma * conv_i(conv_h(.))) channel map: z = Wc @ x + bc   -> (C, HW)
    z = jnp.dot(wc_ref[...], x_full,
                preferred_element_type=jnp.float32) + bc_ref[...]

    # (att @ z^T)^T == z @ att^T : contract the key (lane) dim of both operands.
    # Same orientation as the flash-attention Q @ K^T pattern -> native MXU trans_b.
    y = jax.lax.dot_general(
        z.astype(att_ref.dtype), att_ref[0],
        dimension_numbers=(((1,), (1,)), ((), ())),
        preferred_element_type=jnp.float32)                       # (C, TQ)

    o_ref[0] = (y + bi_ref[...] + xq_ref[0]).astype(o_ref.dtype)


def _vmem_need_bytes(hw, tq, att_itemsize, c):
    need = 2 * tq * hw * att_itemsize        # double-buffered att tile (dominant)
    need += 2 * c * hw * 4                   # x (all keys), double-buffered
    need += 4 * c * tq * 4                   # x query slice + output tile, 2 bufs each
    need += 4 * c * (c + 2)                  # folded weight + biases
    return need


def _pick_query_tile(hw, att_itemsize, c, budget_bytes=40 << 20):
    """Largest multiple-of-128 query tile whose double-buffered working set fits
    comfortably in VMEM on all generations (v7x: 64 MiB physical per TC)."""
    for tq in (8192, 4096, 2048, 1024, 512, 256, 128):
        if tq > max(hw, 128):
            continue
        if _vmem_need_bytes(hw, tq, att_itemsize, c) <= budget_bytes:
            return tq
    return 128


def self_attention_post(x_nchw, att, gamma, w_h_sn, b_h, w_i_sn, b_i, *, tq=None):
    """SelfAttentionPost forward.

    x_nchw: (B, C, W, H) f32; att: (B, W*H, W*H); gamma: scalar;
    w_h_sn: (A, C) spectral-normalized 1x1 conv weight; b_h: (A,);
    w_i_sn: (C, A) spectral-normalized 1x1 conv weight; b_i: (C,).
    Returns (B, C, W, H).
    """
    B, C, W, H = x_nchw.shape
    HW = W * H

    # Fold gamma + both 1x1 convs into one (C, C) channel map (pure linear algebra,
    # done once on the parameter side):  out = att @ (g*(xWh+bh)) Wi + bi + x
    #                                        = att @ (x Wc^T + bc) + bi + x
    wc = (gamma * (w_i_sn @ w_h_sn)).astype(jnp.float32)            # (C, C)
    bc = (gamma * (w_i_sn @ b_h)).reshape(C, 1).astype(jnp.float32)  # (C, 1)
    bi = b_i.reshape(C, 1).astype(jnp.float32)                       # (C, 1)

    x_cm = x_nchw.reshape(B, C, HW)            # channel-major; NO transpose needed
    att_bf16 = att.astype(jnp.bfloat16)        # halve the dominant HBM stream

    if tq is None:
        tq = _pick_query_tile(HW, att_bf16.dtype.itemsize, C)
    tq = min(tq, max(HW, 128))
    n_q = pl.cdiv(HW, tq)

    need = _vmem_need_bytes(HW, tq, att_bf16.dtype.itemsize, C)
    vmem_limit = int(min(56 << 20, max(need + (4 << 20), 16 << 20)))

    cost = pl.CostEstimate(
        flops=2 * B * C * HW * HW + 2 * B * C * C * HW,
        transcendentals=0,
        bytes_accessed=B * HW * HW * att_bf16.dtype.itemsize + 2 * B * C * HW * 4,
    )

    out_cm = pl.pallas_call(
        _self_attn_post_kernel,
        out_shape=jax.ShapeDtypeStruct((B, C, HW), x_cm.dtype),
        grid=(B, n_q),
        in_specs=[
            pl.BlockSpec((C, C), lambda b, q: (0, 0)),          # folded weight Wc
            pl.BlockSpec((C, 1), lambda b, q: (0, 0)),          # folded bias bc
            pl.BlockSpec((C, 1), lambda b, q: (0, 0)),          # output bias b_i
            pl.BlockSpec((1, C, HW), lambda b, q: (b, 0, 0)),   # x, all key tokens
            pl.BlockSpec((1, C, tq), lambda b, q: (b, 0, q)),   # x, query slice (residual)
            pl.BlockSpec((1, tq, HW), lambda b, q: (b, q, 0)),  # att tile (bf16)
        ],
        out_specs=pl.BlockSpec((1, C, tq), lambda b, q: (b, 0, q)),
        compiler_params=pltpu.CompilerParams(
            dimension_semantics=("parallel", "parallel"),
            vmem_limit_bytes=vmem_limit,
        ),
        cost_estimate=cost,
    )(wc, bc, bi, x_cm, x_cm, att_bf16)

    return out_cm.reshape(B, C, W, H)


# ---------------- plain-JAX parameter glue (SpectralNorm weight prep) ----------------

def _l2normalize(v, eps=1e-12):
    return v / (jnp.linalg.norm(v) + eps)


def spectral_norm_weight(w, u):
    """One power-iteration step of spectral normalization (as in the hw2 SpectralNorm wrapper)."""
    out_ch = w.shape[0]
    w_mat = w.reshape(out_ch, -1)
    v = _l2normalize(w_mat.T @ u)
    u = _l2normalize(w_mat @ v)
    sigma = u @ (w_mat @ v)
    return w / sigma


if __name__ == "__main__":
    key = jax.random.PRNGKey(0)
    B, C, A, W, H = 2, 4, 8, 16, 16            # input_size=4, attention_size=8
    HW = W * H
    ks = jax.random.split(key, 8)

    # Inputs
    x = jax.random.normal(ks[0], (B, C, W, H), jnp.float32)
    att = jax.nn.softmax(jax.random.normal(ks[1], (B, HW, HW), jnp.float32), axis=-1)

    # Parameters (deterministic).  gamma is a scalar nn.Parameter (init 0.0 in the
    # module); a nonzero value is used here so the attention path is exercised.
    gamma_val = jnp.float32(0.5)
    w_h = jax.random.normal(ks[2], (A, C, 1, 1), jnp.float32) * 0.2   # Conv2d(C->A, 1x1)
    b_h = jax.random.normal(ks[3], (A,), jnp.float32) * 0.1
    w_i = jax.random.normal(ks[4], (C, A, 1, 1), jnp.float32) * 0.2   # Conv2d(A->C, 1x1)
    b_i = jax.random.normal(ks[5], (C,), jnp.float32) * 0.1
    u_h = jax.random.normal(ks[6], (A,), jnp.float32)
    u_i = jax.random.normal(ks[7], (C,), jnp.float32)

    # SpectralNorm(weight) applied as weight preprocessing (glue).
    w_h_sn = spectral_norm_weight(w_h, u_h)[:, :, 0, 0]   # (A, C)
    w_i_sn = spectral_norm_weight(w_i, u_i)[:, :, 0, 0]   # (C, A)

    # tq=128 exercises the query-tiled grid (grid = (B, HW // 128) = (2, 2)).
    out = jax.block_until_ready(
        self_attention_post(x, att, gamma_val, w_h_sn, b_h, w_i_sn, b_i, tq=128))

    # Plain-JAX f32 reference following the module's unfolded math.
    x_tok = jnp.transpose(x, (0, 2, 3, 1)).reshape(B, HW, C)
    h_ref = gamma_val * (x_tok @ w_h_sn.T + b_h)
    h_ref = jnp.einsum("bqk,bka->bqa", att, h_ref)
    ref_tok = h_ref @ w_i_sn.T + b_i + x_tok
    ref = jnp.transpose(ref_tok.reshape(B, W, H, C), (0, 3, 1, 2))

    assert out.shape == (B, C, W, H)
    # att streams in bf16 (f32 MXU accumulation) -> tolerance sized for bf16 rounding.
    assert jnp.allclose(out, ref, atol=5e-3, rtol=5e-3), "mismatch vs reference"
    print("KERNEL_OK")
</pallas_src>

<mosaic_0001>
module attributes {stable_mosaic.version = 11 : i64} {
  func.func @_self_attn_post_kernel(%arg0: i32, %arg1: i32, %arg2: memref<4x4xf32, #tpu.memory_space<vmem>>, %arg3: memref<4x1xf32, #tpu.memory_space<vmem>>, %arg4: memref<4x1xf32, #tpu.memory_space<vmem>>, %arg5: memref<1x4x256xf32, #tpu.memory_space<vmem>>, %arg6: memref<1x4x128xf32, #tpu.memory_space<vmem>>, %arg7: memref<1x128x256xbf16, #tpu.memory_space<vmem>>, %arg8: memref<1x4x128xf32, #tpu.memory_space<vmem>>) attributes {dimension_semantics = [#tpu.dimension_semantics<parallel>, #tpu.dimension_semantics<parallel>], iteration_bounds = array<i64: 2, 2>, scalar_prefetch = 0 : i64, scratch_operands = 0 : i64, tpu.core_type = #tpu.core_type<tc>, window_params = [{pipeline_mode = #tpu.pipeline_mode<synchronous>, transform_indices = @transform_0, window_bounds = array<i64: 4, 4>}, {pipeline_mode = #tpu.pipeline_mode<synchronous>, transform_indices = @transform_1, window_bounds = array<i64: 4, 1>}, {pipeline_mode = #tpu.pipeline_mode<synchronous>, transform_indices = @transform_2, window_bounds = array<i64: 4, 1>}, {transform_indices = @transform_3, window_bounds = array<i64: 1, 4, 256>}, {transform_indices = @transform_4, window_bounds = array<i64: 1, 4, 128>}, {transform_indices = @transform_5, window_bounds = array<i64: 1, 128, 256>}, {transform_indices = @transform_6, window_bounds = array<i64: 1, 4, 128>}]} {
    %c0 = arith.constant 0 : index
    %c0_0 = arith.constant 0 : index
    %c0_1 = arith.constant 0 : index
    %0 = vector.load %arg5[%c0, %c0_0, %c0_1] : memref<1x4x256xf32, #tpu.memory_space<vmem>>, vector<1x4x256xf32>
    %1 = vector.shape_cast %0 : vector<1x4x256xf32> to vector<4x256xf32>
    %c0_2 = arith.constant 0 : index
    %c0_3 = arith.constant 0 : index
    %2 = vector.load %arg2[%c0_2, %c0_3] : memref<4x4xf32, #tpu.memory_space<vmem>>, vector<4x4xf32>
    %cst = arith.constant dense<0.000000e+00> : vector<4x256xf32>
    %3 = tpu.matmul %2, %1, %cst {dimension_numbers = #tpu.dot_dimension_numbers<[1], [0], [0], [1], [0, 0, 1, 1], [], []>} : vector<4x4xf32>, vector<4x256xf32>, vector<4x256xf32> -> vector<4x256xf32>
    %c0_4 = arith.constant 0 : index
    %c0_5 = arith.constant 0 : index
    %4 = vector.load %arg3[%c0_4, %c0_5] : memref<4x1xf32, #tpu.memory_space<vmem>>, vector<4x1xf32>
    %5 = vector.broadcast %4 : vector<4x1xf32> to vector<4x256xf32>
    %6 = arith.addf %3, %5 : vector<4x256xf32>
    %7 = arith.truncf %6 : vector<4x256xf32> to vector<4x256xbf16>
    %c0_6 = arith.constant 0 : index
    %c0_7 = arith.constant 0 : index
    %c0_8 = arith.constant 0 : index
    %8 = vector.load %arg7[%c0_6, %c0_7, %c0_8] : memref<1x128x256xbf16, #tpu.memory_space<vmem>>, vector<1x128x256xbf16>
    %9 = vector.shape_cast %8 : vector<1x128x256xbf16> to vector<128x256xbf16>
    %cst_9 = arith.constant dense<0.000000e+00> : vector<4x128xf32>
    %10 = tpu.matmul %7, %9, %cst_9 {dimension_numbers = #tpu.dot_dimension_numbers<[1], [1], [0], [0], [0, 0, 1, 0], [], []>} : vector<4x256xbf16>, vector<128x256xbf16>, vector<4x128xf32> -> vector<4x128xf32>
    %c0_10 = arith.constant 0 : index
    %c0_11 = arith.constant 0 : index
    %11 = vector.load %arg4[%c0_10, %c0_11] : memref<4x1xf32, #tpu.memory_space<vmem>>, vector<4x1xf32>
    %12 = vector.broadcast %11 : vector<4x1xf32> to vector<4x128xf32>
    %13 = arith.addf %10, %12 : vector<4x128xf32>
    %c0_12 = arith.constant 0 : index
    %c0_13 = arith.constant 0 : index
    %c0_14 = arith.constant 0 : index
    %14 = vector.load %arg6[%c0_12, %c0_13, %c0_14] : memref<1x4x128xf32, #tpu.memory_space<vmem>>, vector<1x4x128xf32>
    %15 = vector.shape_cast %14 : vector<1x4x128xf32> to vector<4x128xf32>
    %16 = arith.addf %13, %15 : vector<4x128xf32>
    %c0_15 = arith.constant 0 : index
    %c0_16 = arith.constant 0 : index
    %c0_17 = arith.constant 0 : index
    %17 = vector.load %arg8[%c0_15, %c0_16, %c0_17] : memref<1x4x128xf32, #tpu.memory_space<vmem>>, vector<1x4x128xf32>
    %18 = vector.shape_cast %17 : vector<1x4x128xf32> to vector<4x128xf32>
    %19 = vector.shape_cast %16 : vector<4x128xf32> to vector<1x4x128xf32>
    tpu.vector_store %arg8[%c0_15, %c0_16, %c0_17], %19 {strides = array<i32>} : memref<1x4x128xf32, #tpu.memory_space<vmem>>, vector<1x4x128xf32>,
    return
  }
  func.func @transform_0(%arg0: i32, %arg1: i32) -> (i32, i32) {
    %c0_i32 = arith.constant 0 : i32
    %c0_i32_0 = arith.constant 0 : i32
    %c0_i32_1 = arith.constant 0 : i32
    return %c0_i32, %c0_i32_0 : i32, i32
  }
  func.func @transform_1(%arg0: i32, %arg1: i32) -> (i32, i32) {
    %c0_i32 = arith.constant 0 : i32
    %c0_i32_0 = arith.constant 0 : i32
    %c0_i32_1 = arith.constant 0 : i32
    return %c0_i32, %c0_i32_0 : i32, i32
  }
  func.func @transform_2(%arg0: i32, %arg1: i32) -> (i32, i32) {
    %c0_i32 = arith.constant 0 : i32
    %c0_i32_0 = arith.constant 0 : i32
    %c0_i32_1 = arith.constant 0 : i32
    return %c0_i32, %c0_i32_0 : i32, i32
  }
  func.func @transform_3(%arg0: i32, %arg1: i32) -> (i32, i32, i32) {
    %c0_i32 = arith.constant 0 : i32
    %c0_i32_0 = arith.constant 0 : i32
    %c0_i32_1 = arith.constant 0 : i32
    return %arg0, %c0_i32, %c0_i32_0 : i32, i32, i32
  }
  func.func @transform_4(%arg0: i32, %arg1: i32) -> (i32, i32, i32) {
    %c0_i32 = arith.constant 0 : i32
    %c0_i32_0 = arith.constant 0 : i32
    return %arg0, %c0_i32, %arg1 : i32, i32, i32
  }
  func.func @transform_5(%arg0: i32, %arg1: i32) -> (i32, i32, i32) {
    %c0_i32 = arith.constant 0 : i32
    %c0_i32_0 = arith.constant 0 : i32
    return %arg0, %arg1, %c0_i32 : i32, i32, i32
  }
  func.func @transform_6(%arg0: i32, %arg1: i32) -> (i32, i32, i32) {
    %c0_i32 = arith.constant 0 : i32
    %c0_i32_0 = arith.constant 0 : i32
    return %arg0, %c0_i32, %arg1 : i32, i32, i32
  }
}

</mosaic_0001>

<bundles_post_ra>
// kernel: tpu_custom_call.1
= control target key start
LH: loop header
LB: loop body
LE: loop exit
PB: predicated region body
PF: predicated region fallthrough
CT: control target
= control target key end

     0   :  { %s1512_s0 = inlined_call_operand.hbm [shape: f32[4,4], index: 0, kind: input, shape index: {}]   ;;  %s1513_s1 = inlined_call_operand.vmem [shape: f32[4,1], index: 1, kind: input, shape index: {}]   ;;  %s1514_s2 = inlined_call_operand.vmem [shape: f32[4,1], index: 2, kind: input, shape index: {}]   ;;  %s1515_s3 = inlined_call_operand.hbm [shape: f32[2,4,256], index: 3, kind: input, shape index: {}]   ;;  %s1516_s4 = inlined_call_operand.vmem [shape: f32[2,4,256], index: 4, kind: input, shape index: {}]   ;;  %s1517_s5 = inlined_call_operand.hbm [shape: bf16[2,256,256], index: 5, kind: input, shape index: {}]   ;;  %s1518_s6 = inlined_call_operand.hbm [shape: f32[2,4,256], index: 6, kind: output, shape index: {}]  }
   0x1   :  { %1527 = sst [smem:[#allocation19_spill]] %s1514_s2 }
   0x2   :  { %1528 = sst [smem:[#allocation20_spill]] %s1515_s3 }
   0x3   :  { %1529 = sst [smem:[#allocation21_spill]] %s1516_s4 }
   0x4   :  { %1530 = sst [smem:[#allocation22_spill]] %s1518_s6 }
   0x5   :  { %11 = vsyncpa [#allocation3], 0 }
   0x6   :  { %12 = vsyncpa [#allocation6], 0 }
   0x7   :  { %14 = vsyncpa [#allocation6 + $0x1], 0 }
   0x8   :  { %15 = vsyncpa [#allocation4], 0 }
   0x9   :  { %17 = vsyncpa [#allocation4 + $0x1], 0  ;;  %s1208_s21 = smov 0   ;;  %s1210_s22 = smov 0  }
   0xa   :  { %s1212_s23 = smov 0   ;;  %s1214_s24 = smov 0  }
   0xb   :  { %s1216_s25 = smov 0   ;;  %s1218_s26 = smov 0  }
   0xc   :  { %s1220_s27 = smov 0   ;;  %s1222_s28 = smov 0  }
   0xd   :  { %s1224_s29 = smov 0   ;;  %s1226_s30 = smov 0  }
   0xe   :  { %s1228_s7 = smov 0  }
   0xf LB: > { %1531 = sst [smem:[#allocation13_spill]] %s1147_s27  ;;  %s32_s8 = sadd.s32 1, %s1155_s29  ;;  %s1163_s7 = sphi %s1228_s7, %s23_s7   ;;  %s1159_s30 = sphi %s1226_s30, %s1568_s30   ;;  %s1155_s29 = sphi %s1224_s29, %s1558_s29   ;;  %s1151_s28 = sphi %s1222_s28, %s1567_s28   ;;  %s1147_s27 = sphi %s1220_s27, %s1566_s27   ;;  %s1143_s26 = sphi %s1218_s26, %s1565_s26   ;;  %s1139_s25 = sphi %s1216_s25, %s1564_s25   ;;  %s1135_s24 = sphi %s1214_s24, %s1563_s24   ;;  %s1131_s23 = sphi %s1212_s23, %s1562_s23   ;;  %s1127_s22 = sphi %s1210_s22, %s1561_s22   ;;  %s1123_s21 = sphi %s1208_s21, %s1560_s21  }
  0x10   : > { %1532 = sst [smem:[#allocation14_spill]] %s1151_s28  ;;  %s35_s9 = sadd.s32 1, %s1159_s30 }
  0x11   : > { %1533 = sst [smem:[#allocation15_spill]] %s1155_s29  ;;  %p33_p0 = scmp.ge.s32.totalorder %s32_s8, 2 }
  0x12   : > { %s105_s10 = sadd.s32 1, %s1143_s26  ;;  %p112_p1 = scmp.ne.s32.totalorder %s1143_s26, %s1139_s25 }
  0x13   : > { %p113_p2 = scmp.eq.s32.totalorder %s1163_s7, 0  ;;  %s1570_s8 = smov (%p33_p0, %s32_s8), 0 }
  0x14   : > { %1534 = sst [smem:[#allocation16_spill]] %s1570_s8  ;;  %s1572_s9 = smov (!%p33_p0, %s35_s9), %s1159_s30 }
  0x15   : > { %p1272_p3 = por %p113_p2, %p112_p1  ;;  %s157_s12 = ssub.s32 %s1155_s29, %s1570_s8 }
  0x16   : > { %p37_p4 = scmp.ge.s32.totalorder %s1572_s9, 2  ;;  %s161_s13 = sadd.s32 1, %s1131_s23 }
  0x17   : > { %p168_p5 = scmp.ne.s32.totalorder %s1131_s23, %s1127_s22  ;;  %p831_p7 = scmp.lt.s32.totalorder %s1163_s7, 4 }
  0x18   : > { %s1574_s9 = smov (%p37_p4, %s1572_s9), 0  ;;  %s243_s16 = sand.u32 1, %s1163_s7  }
  0x19   : > { %1536 = sst [smem:[#allocation17_spill]] %s1574_s9  ;;  %p1286_p6 = por %p168_p5, %p113_p2 }
  0x1a   : > { %s102_s15 = ssub.s32 %s1159_s30, %s1574_s9  ;;  %s245_s20 = sand.u32 1, %s1143_s26  }
  0x1b   : > { %p103_p8 = scmp.eq.s32.totalorder %s102_s15, 0  ;;  %s158_s17 = sor.u32 %s157_s12, %s102_s15 }
  0x1c   : > { %p159_p9 = scmp.eq.s32.totalorder %s158_s17, 0  ;;  %s803_s8 = sshll.u32 %s1159_s30, 7 }
  0x1d   : > { %s1295_s18 = scalar_select %p103_p8, %s1143_s26, %s105_s10  }
  0x1e   : > { %s1298_s19 = scalar_select %p159_p9, %s1131_s23, %s161_s13  }
  0x1f   : > { %1538 = sst [smem:[#allocation18_spill]] %s1295_s18  ;;  %s764_s6 = sshll.u32 %s245_s20, 3 }
  0x20   : > { %s1539_s3 = sld [smem:[#allocation20_spill]]  ;;  %p1309_p10 = pnand %p831_p7, %p1272_p3 }
  0x21   : > { %s247_s12 = scalar_lea.vmem [#allocation5], %s764_s6  ;;  %p1317_p11 = pnand %p831_p7, %p1286_p6 }
  0x22   : > { %s255_s15 = sshll.u32 %s247_s12, 4  ;;  %s1321_s13 = scalar_lea.sflag [#allocation6], %s243_s16  ;;  %s256_s15 = int_to_ptr.vmem [resolvable:$true] %s255_s15 }
  0x23   : > { %p955_p12 = pneg %p1309_p10  ;;  %s966_s4 = scalar_lea.vmem %s256_s15, 128 }
  0x24   : > { %p967_p13 = scmp.ne.s32.totalorder %s256_s15, %s966_s4  ;;  %s1165_s27 = smov [#allocation5]  }
  0x26   : > { %s253_s28 = scalar_lea.hbm %s1539_s3, %s803_s8  ;;  %p969_p0 = pnand %p967_p13, %p955_p12 }
  0x27   : > { %s971_s8 = sshll.u32 %s1165_s27, 4  ;;  %s972_s8 = int_to_ptr.vmem [resolvable:$false] %s971_s8 }
  0x28   : > { %p970_p1 = pneg %p969_p0  ;;  %s973_s6 = scalar_lea.vmem %s972_s8, 256 }
  0x29   : > { %p974_p2 = scmp.lt.s32.totalorder %s256_s15, %s972_s8  ;;  %p975_p3 = scmp.lt.s32.totalorder %s973_s6, %s966_s4 }
  0x2b   : > { %p976_p4 = por %p975_p3, %p974_p2 }
  0x2d   : > { %p977_p6 = pnand %p976_p4, %p970_p1 }
  0x2f   : > { %980 = shalt.err (!%p977_p6)
}
  0x30   : > { %822 = dma.hbm_to_vmem [thread:$0]  (!%p1309_p10), %s253_s28, 128, %s256_s15, %s1321_s13  }
  0x31   : > { %s1329_s11 = sadd.s32 4294967295, %s1163_s7   ;;  %s760_s14 = sadd.s32 4294967294, %s1163_s7  }
  0x32   : > { %p118_p7 = scmp.ne.s32.totalorder %s1139_s25, %s1135_s24  ;;  %p119_p8 = scmp.eq.s32.totalorder %s1329_s11, 0 }
  0x33   : > { %p174_p9 = scmp.ne.s32.totalorder %s1127_s22, %s1123_s21  ;;  %p200_p12 = scmp.eq.s32.totalorder %s1329_s11, 3 }
  0x34   : > { %p206_p13 = scmp.eq.s32.totalorder %s760_s14, 3  ;;  %p1340_p0 = por %p119_p8, %p118_p7 }
  0x35   : > { %p1346_p10 = por %p174_p9, %p119_p8  ;;  %p1353_p1 = por %p200_p12, %p168_p5 }
  0x36   : > { %p1357_p2 = por %p206_p13, %p174_p9  ;;  %p761_p3 = scmp.ge.s32.totalorder %s1163_s7, 1 }
  0x37   : > { %s1543_s28 = scalar_select %p1346_p10, 1, 0 }
  0x38   : > { %s1544_s24 = scalar_select %p1353_p1, 1, 0 }
  0x39   : > { %s1545_s16 = scalar_select %p1357_p2, 1, 0 }
  0x3a   : > { %p213_p4 = scmp.lt.s32.totalorder %s1163_s7, 5  ;;  %s1166_s20 = smov [#allocation2]  }
  0x3b   : > { %s226_s12 = sshll.u32 %s1166_s20, 4  ;;  %s275_s15 = sand.u32 1, %s1131_s23   ;;  %s227_s12 = int_to_ptr.vmem [resolvable:$true] %s226_s12 }
  0x3c   : > { %p1363_p6 = pnand %p761_p3, %p213_p4  ;;  %s767_s4 = sshll.u32 %s275_s15, 7 }
  0x3d   : > { %s804_s27 = sshll.u32 %s1155_s29, 5  ;;  %s770_s6 = sshll.u32 %s1159_s30, 6 }
  0x3e   : > { %p815_p5 = pneg %p1363_p6  ;;  %s284_s14 = sadd.s32 %s804_s27, %s770_s6 }
  0x3f   : > { %s277_s3 = scalar_lea.vmem [#allocation7], %s767_s4  ;;  %s771_s18 = sshll.u32 %s284_s14, 6 }
  0x40   : > { %p1373_p7 = pnand %p815_p5, %p119_p8  ;;  %s287_s9 = sshll.u32 %s277_s3, 4  ;;  %s288_s9 = int_to_ptr.vmem [resolvable:$true] %s287_s9 }
  0x41   : > { %s992_s20 = scalar_lea.vmem %s227_s12, 64  ;;  %p1000_p4 = scmp.lt.s32.totalorder %s227_s12, %s227_s12 }
  0x42   : > { %p983_p9 = pneg %p1373_p7  ;;  %p993_p12 = scmp.ne.s32.totalorder %s227_s12, %s992_s20 }
  0x43   : > { %p1001_p2 = scmp.lt.s32.totalorder %s992_s20, %s992_s20 }
  0x44   : > { %p995_p13 = pnand %p993_p12, %p983_p9 }
  0x45   : > { %p1002_p1 = por %p1001_p2, %p1000_p4 }
  0x46   : > { %p996_p3 = pneg %p995_p13 }
  0x48   : > { %p1003_p10 = pnand %p1002_p1, %p996_p3 }
  0x4a   : > { %1006 = shalt.err (!%p1003_p10)
}
  0x4b   : > { %818 = dma.hbm_to_vmem [thread:$0]  (!%p1373_p7), %s1512_s0, 64, %s227_s12, [#allocation3]  }
  0x4c   : > { %s286_s27 = scalar_lea.hbm %s1517_s5, %s771_s18  ;;  %p1009_p5 = pneg %p1317_p11 }
  0x4d   : > { %s1020_s6 = scalar_lea.vmem %s288_s9, 2048  ;;  %s1167_s14 = smov [#allocation7]  }
  0x4e   : > { %p1021_p9 = scmp.ne.s32.totalorder %s288_s9, %s1020_s6  ;;  %s1025_s20 = sshll.u32 %s1167_s14, 4  ;;  %s1026_s20 = int_to_ptr.vmem [resolvable:$false] %s1025_s20 }
  0x4f   : > { %s1027_s8 = scalar_lea.vmem %s1026_s20, 4096  ;;  %p1028_p10 = scmp.lt.s32.totalorder %s288_s9, %s1026_s20 }
  0x50   : > { %p1023_p12 = pnand %p1021_p9, %p1009_p5  ;;  %p1029_p1 = scmp.lt.s32.totalorder %s1027_s8, %s1020_s6 }
  0x52   : > { %p1024_p2 = pneg %p1023_p12  ;;  %p1030_p13 = por %p1029_p1, %p1028_p10 }
  0x54   : > { %p1031_p3 = pnand %p1030_p13, %p1024_p2 }
  0x56   : > { %1034 = shalt.err (!%p1031_p3)
}
  0x57   : > { %s1168_s29 = smov 128   ;;  %s1169_s18 = smov 8  }
  0x58   : > { %825 = dma.hbm_to_vmem [thread:$0]  (!%p1317_p11), %s286_s27, 2048, %s288_s9, %s1321_s13, %s1168_s29, %s1168_s29, %s1169_s18  }
  0x59   : > { %299 = sbr.rel (%p1363_p6) target bundleno = 519 (0x207), region = 44 }
  0x5e   : > { %1106 = dma.done.wait (%p119_p8), [#allocation3], 64  }
  0x5f   : > { %1108 = vsyncadd (%p119_p8), [#allocation3], 4294967232  ;;  %s305_s12 = sand.u32 1, %s1329_s11   ;;  %s307_s15 = sand.u32 1, %s1139_s25  }
  0x60   : > { %s774_s3 = sshll.u32 %s307_s15, 3  ;;  %s306_s4 = scalar_lea.sflag [#allocation6], %s305_s12 }
  0x61   : > { %s309_s6 = scalar_lea.vmem [#allocation5], %s774_s3 }
  0x62   : > { %1110 = dma.done.wait (%p1340_p0), %s306_s4, 128  }
  0x63   : > { %1112 = vsyncadd (%p1340_p0), %s306_s4, 4294967168  ;;  %s1406_s9 = sand.u32 1, %s1127_s22   ;;  %p1548_p11 = scmp.ne.s32.totalorder %s1543_s28, 0 }
  0x64   : > { %s775_s10 = sshll.u32 %s1406_s9, 7 }
  0x65   : > { %s1409_s13 = scalar_lea.vmem [#allocation7], %s775_s10 }
  0x66   : > { %1114 = dma.done.wait (%p1548_p11), %s306_s4, 2048  }
  0x67   : > { %1116 = vsyncadd (%p1548_p11), %s306_s4, 4294965248  ;;  %v1170_v0 = vmov 0.0   ;;  %v1171_v1 = vmov 0   ;;  %v370_v2 = vld [vmem:[%s309_s6] sm:$0xff]  ;;  %vm384_vm0 = vcmask 1043456   ;;  %s1549_s27 = sld [smem:[#allocation19_spill]] }
  0x68   : > { %453 = vmatprep.mubr.f32.mxu0 %v1170_v0  ;;  %927 = vset.pattern.permute.xlu0 %v1171_v1  ;;  %v371_v3 = vld [vmem:[#allocation2] sm:$0xf]  ;;  %v379_v5 = vcombine.high %v370_v2, %v370_v2  ;;  %vm380_vm1 = vcmask 31744   ;;  %v929_v7 = vld [vmem:[%s1409_s13 + $0x74] ss:$8 sps:$4 sm:$0xff]   ;;  %s1550_s14 = sld [smem:[#allocation14_spill]] }
  0x69   : > { %v372_v4 = vld [vmem:[%s1513_s1] sm:$0xf]  ;;  %v931_v8 = vld [vmem:[%s1409_s13 + $0x70] ss:$8 sps:$4 sm:$0xff]   ;;  %564 = vmatprep.subr.bf16.mxu1 %v929_v7  ;;  %v934_v10 = vld [vmem:[%s1409_s13 + $0x60] ss:$8 sps:$4 sm:$0xff]  }
  0x6a   : > { %375 = vperm.xlu0 %927, %v372_v4   ;;  %779 = vmatprep.subr.msk.mxu0 %vm384_vm0, %v379_v5  ;;  %v932_v9 = vld [vmem:[%s1409_s13 + $0x64] ss:$8 sps:$4 sm:$0xff]   ;;  %v935_v11 = vld [vmem:[%s1409_s13 + $0x54] ss:$8 sps:$4 sm:$0xff]   ;;  %v937_v12 = vld [vmem:[%s1409_s13 + $0x50] ss:$8 sps:$4 sm:$0xff]  }
  0x6b   : > { %780 = vmatpush1.msk.msra.mxu0 %vm384_vm0, %v370_v2  ;;  %565 = vmatpush1.bf16.xpose.msra.mxu1 %v931_v8  ;;  %v938_v13 = vld [vmem:[%s1409_s13 + $0x44] ss:$8 sps:$4 sm:$0xff]   ;;  %v940_v14 = vld [vmem:[%s1409_s13 + $0x40] ss:$8 sps:$4 sm:$0xff]   ;;  %v941_v15 = vld [vmem:[%s1409_s13 + $0x34] ss:$8 sps:$4 sm:$0xff]  }
  0x6c   : > { %781 = vmatmul.mubr.msk.f32.vlgmr.msra.gmra.mxu0 %vm380_vm1, %v371_v3  ;;  %566 = vmatprep.subr.bf16.mxu1 %v932_v9  ;;  %v943_v16 = vld [vmem:[%s1409_s13 + $0x30] ss:$8 sps:$4 sm:$0xff]   ;;  %v944_v17 = vld [vmem:[%s1409_s13 + $0x24] ss:$8 sps:$4 sm:$0xff]   ;;  %v946_v18 = vld [vmem:[%s1409_s13 + $0x20] ss:$8 sps:$4 sm:$0xff]  }
  0x6d   : > { %v478_v6 = vld [vmem:[%s1549_s27] sm:$0xf]  ;;  %v947_v19 = vld [vmem:[%s1409_s13 + $0x14] ss:$8 sps:$4 sm:$0xff]   ;;  %v949_v20 = vld [vmem:[%s1409_s13 + $0x10] ss:$8 sps:$4 sm:$0xff]  }
  0x6e   : > { %481 = vperm.xlu0 %927, %v478_v6   ;;  %s1551_s20 = sld [smem:[#allocation13_spill]]  ;;  %v950_v21 = vld [vmem:[%s1409_s13 + $0x4] ss:$8 sps:$4 sm:$0xff]   ;;  %v952_v22 = vld [vmem:[%s1409_s13] ss:$8 sps:$4 sm:$0xff]   ;;  %p360_p8 = scmp.lt.s32.totalorder %s1550_s14, 1 }
  0x6f   : > { %s776_s3 = sshll.u32 %s1406_s9, 2  ;;  %s799_s4 = sshll.u32 %s1550_s14, 1 }
  0x70   : > { %s361_s8 = scalar_select %p360_p8, %s1550_s14, 1 }
  0x71   : > { %s1552_s13 = sld [smem:[#allocation21_spill]]  ;;  %s359_s17 = scalar_lea.vmem [#allocation8], %s776_s3 }
  0x72   : > { %s777_s18 = sshll.u32 %s361_s8, 1  ;;  %s623_s27 = sshll.u32 %s359_s17, 4  ;;  %s1452_s27 = int_to_ptr.vmem [resolvable:$true] %s623_s27 }
  0x73   : > { %567 = vmatpush1.bf16.xpose.msra.mxu1 %v934_v10  ;;  %p1554_p7 = scmp.ne.s32.totalorder %s1544_s24, 0 }
  0x74   : > { %568 = vmatprep.subr.bf16.mxu1 %v935_v11  ;;  %p362_p0 = scmp.lt.s32.totalorder %s1551_s20, 1  ;;  %s619_s2 = sadd.s32 %s1551_s20, %s799_s4 }
  0x75   : > { %s800_s28 = sshll.u32 %s619_s2, 6 }
  0x76   : > { %s363_s29 = scalar_select %p362_p0, %s1551_s20, 1 }
  0x77   : > { %s608_s20 = scalar_lea.sflag [#allocation4], %s1406_s9 }
  0x78   : > { %s365_s12 = sadd.s32 %s777_s18, %s363_s29  ;;  %s1553_s18 = sld [smem:[#allocation22_spill]] }
  0x79   : > { %s778_s15 = sshll.u32 %s365_s12, 2  ;;  %s1035_s12 = scalar_lea.vmem %s1452_s27, 64 }
  0x7a   : > { %s367_s11 = scalar_lea.vmem %s1552_s13, %s778_s15  ;;  %p1036_p6 = scmp.ne.s32.totalorder %s1452_s27, %s1035_s12 }
  0x7b   : > { %569 = vmatpush1.bf16.xpose.msra.mxu1 %v937_v12  ;;  %v604_v32 = vld [vmem:[%s367_s11] sm:$0xf]  ;;  %s1172_s15 = smov [#allocation8]  }
  0x7c   : > { %570 = vmatprep.subr.bf16.mxu1 %v938_v13  ;;  %p1037_p4 = pnand %p1036_p6, %p1554_p7  ;;  %s1039_s3 = sshll.u32 %s1172_s15, 4  ;;  %s1040_s3 = int_to_ptr.vmem [resolvable:$false] %s1039_s3 }
  0x7d   : > { %s1041_s4 = scalar_lea.vmem %s1040_s3, 128  ;;  %p1042_p9 = scmp.lt.s32.totalorder %s1452_s27, %s1040_s3 }
  0x7e   : > { %s1450_s14 = scalar_lea.hbm %s1553_s18, %s800_s28  ;;  %p1038_p5 = pneg %p1037_p4 }
  0x7f   : > { %p1043_p12 = scmp.lt.s32.totalorder %s1041_s4, %s1035_s12 }
  0x81   : > { %p1044_p2 = por %p1043_p12, %p1042_p9 }
  0x83   : > { %571 = vmatpush1.bf16.xpose.msra.mxu1 %v940_v14  ;;  %p1045_p10 = pnand %p1044_p2, %p1038_p5 }
  0x84   : > { %572 = vmatprep.subr.bf16.mxu1 %v941_v15 }
  0x8b   : > { %573 = vmatpush1.bf16.xpose.msra.mxu1 %v943_v16 }
  0x8c   : > { %574 = vmatprep.subr.bf16.mxu1 %v944_v17 }
  0x93   : > { %575 = vmatpush1.bf16.xpose.msra.mxu1 %v946_v18 }
  0x94   : > { %576 = vmatprep.subr.bf16.mxu1 %v947_v19 }
  0x9b   : > { %577 = vmatpush1.bf16.xpose.msra.mxu1 %v949_v20 }
  0x9c   : > { %578 = vmatprep.subr.bf16.mxu1 %v950_v21 }
  0xa3   : > { %579 = vmatpush1.bf16.xpose.msra.mxu1 %v952_v22 }
  0xe5   : > { %v376_v24 = vpop.permute.xlu0 %375 }
  0xe9   : > { %v482_v30 = vpop.permute.xlu0 %481 }
 0x12c   : > { %v455_v23 = vpop.f32.mrf.mxu0 }
 0x12d   : > { %v456_v25 = vadd.f32 %v455_v23, %v376_v24 }
 0x12e   : > { %v457_v26 = vpop.f32.mrf.mxu0 }
 0x12f   : > { %v458_v27 = vadd.f32 %v457_v26, %v376_v24  ;;  %v460_v29 = vpack.c.bf16 %v456_v25, %v456_v25 }
 0x131   : > { %v461_v28 = vpack.c.bf16 %v458_v27, %v458_v27 }
 0x133   : > { %596 = vmatprep.mubr.bf16.mxu1 %v461_v28 }
 0x134   : > { %597 = vmatmul.mubr.bf16.vlgmr.msra.gmra.mxu1 %v460_v29 }
 0x1f4   : > { %v598_v31 = vpop.f32.mrf.mxu1 }
 0x1f5   : > { %v599_v33 = vadd.f32 %v598_v31, %v482_v30 }
 0x1f6   : > { %v600_v34 = vpop.f32.mrf.mxu1 }
 0x1f7   : > { %v605_v35 = vadd.f32 %v604_v32, %v599_v33 }
 0x1f8   : > { %v601_v36 = vpop.f32.mrf.mxu1 }
 0x1f9   : > { %606 = vst [vmem:[%s359_s17] sm:$0xf] %v605_v35 }
 0x1fa   : > { %v602_v37 = vpop.f32.mrf.mxu1 }
 0x1fb   : > { %1048 = shalt.err (!%p1045_p10)
}
 0x1fc   : > { %s1049_s6 = scalar_lea.hbm %s1450_s14, 64  ;;  %s1053_s13 = scalar_lea.hbm %s1553_s18, 256 }
 0x1fd   : > { %p1050_p1 = scmp.ne.s32.totalorder %s1450_s14, %s1049_s6  ;;  %p1054_p11 = scmp.lt.s32.totalorder %s1450_s14, %s1553_s18 }
 0x1fe   : > { %p1055_p8 = scmp.lt.s32.totalorder %s1053_s13, %s1049_s6 }
 0x1ff   : > { %p1051_p13 = pnand %p1050_p1, %p1554_p7 }
 0x200   : > { %p1056_p0 = por %p1055_p8, %p1054_p11 }
 0x201   : > { %p1052_p3 = pneg %p1051_p13 }
 0x203   : > { %p1057_p6 = pnand %p1056_p0, %p1052_p3 }
 0x205   : > { %1060 = shalt.err (!%p1057_p6)
}
 0x206   : > { %813 = dma.vmem_to_hbm [thread:$0]  (%p1554_p7), %s1452_s27, 64, %s1450_s14, %s608_s20  }
 0x207 PF: > { %p833_p4 = scmp.ge.s32.totalorder %s1163_s7, 2  ;;  %s635_s28 = sand.u32 1, %s1123_s21  }
 0x208   : > { %p1555_p5 = scmp.ne.s32.totalorder %s1545_s16, 0  ;;  %s636_s17 = scalar_lea.sflag [#allocation4], %s635_s28 }
 0x20a   : > { %p827_p9 = pnand %p833_p4, %p1555_p5 }
 0x20c   : > { %p828_p12 = pneg %p827_p9 }
 0x20e   : > { %1118 = dma.done.wait (%p828_p12), %s636_s17, 64  }
 0x20f   : > { %1120 = vsyncadd (%p828_p12), %s636_s17, 4294967232  ;;  %s23_s7 = sadd.s32 1, %s1163_s7   ;;  %s1556_s27 = sld [smem:[#allocation18_spill]] }
 0x210   : > { %p20_p2 = scmp.ge.s32.totalorder %s23_s7, 6   ;;  %s1557_s8 = sld [smem:[#allocation15_spill]] }
 0x211   : > { %s1558_s29 = sld [smem:[#allocation16_spill]]  ;;  %s1560_s21 = smov %s1127_s22 }
 0x212   : > { %s1559_s14 = sld [smem:[#allocation17_spill]]  ;;  %s1561_s22 = smov %s1131_s23 }
 0x213   : > { %s1562_s23 = smov %s1298_s19  ;;  %s1563_s24 = smov %s1139_s25 }
 0x214   : > { %s1564_s25 = smov %s1143_s26  ;;  %s1567_s28 = smov %s1159_s30 }
 0x215   : > { %s1565_s26 = smov %s1556_s27  ;;  %22 = sbr.rel (!%p20_p2) target bundleno = 15 (0xf), region = 108 }
 0x216   : > { %s1566_s27 = smov %s1557_s8 }
 0x218   : > { %s1568_s30 = smov %s1559_s14 }
 0x21a   :  { %641 = vsyncpa [#allocation3], 1 }
 0x21b   :  { %643 = vsyncpa [#allocation3 + $0x1], 1 }
 0x21c   :  { %644 = vsyncpa [#allocation6], 1 }
 0x21d   :  { %646 = vsyncpa [#allocation6 + $0x1], 1 }
 0x21e   :  { %647 = vsyncpa [#allocation4], 1 }
 0x21f   :  { %649 = vsyncpa [#allocation4 + $0x1], 1 }

</bundles_post_ra>
